<compile_context>
chip_gen: v5e
topology: v5e:2x2
jax: 0.10.0
libtpu: 0.0.40
codegen_flags: <defaults>
</compile_context>

<pallas_src>
import functools

import jax
import jax.numpy as jnp
from jax import lax
from jax.experimental import pallas as pl
from jax.experimental.pallas import tpu as pltpu


def _lau_kernel(q_ref, ub_ref, biasq_ref, wub_ref, wp_ref, w23_ref, b23_ref,
                out_ref):
    """One (batch-block, T-tile) step, feature-major (T in lanes).

    Shapes inside the kernel (Bt = batch block, Tt = T tile in lanes):
      q_ref     : (Bt, 1, E)    per-batch query rows (natural layout)
      ub_ref    : (Bt, E, Tt)   user-behavior slab, feature-major
      biasq_ref : (Bt, H1, 1)   host-precomputed (W1a+W1c)^T q + b1
      wub_ref   : (H1, E)       (W1b - W1c)^T
      wp_ref    : (H1, E)       W1d^T
      w23_ref   : (1, H1)       (W2 @ W3)^T
      b23_ref   : (1, 1)        b2 @ W3 + b3
      out_ref   : (Bt, 1, Tt)
    """
    bt = q_ref.shape[0]

    # Resident weights: load once per grid step, reuse for all Bt batch rows.
    wub = wub_ref[...]
    wp = wp_ref[...]
    w23 = w23_ref[...]
    b23 = b23_ref[...]

    def body(i, carry):
        q_row = q_ref[i]                       # (1, E)
        # Fold the q*ub concat branch into the weights (exact):
        #   W1d^T (q ∘ ub^T) == (W1d^T ∘ q_row) ub^T
        w_eff = wub + wp * q_row               # (H1, E)  per-batch effective W1
        h1 = jnp.dot(w_eff, ub_ref[i],
                     preferred_element_type=jnp.float32)          # (H1, Tt)
        h1 = jnp.maximum(h1 + biasq_ref[i], 0.0)                  # (H1, Tt)
        score = jnp.dot(w23, h1,
                        preferred_element_type=jnp.float32) + b23  # (1, Tt)
        out_ref[i] = score.astype(out_ref.dtype)
        return carry

    # Short fixed trip-count -> fully unroll for the LLO scheduler.
    lax.fori_loop(0, bt, body, None, unroll=True)


def local_activation_unit(query, user_behavior, params, *,
                          t_tile_target=2048, b_tile_target=4):
    """query: (B, 1, E), user_behavior: (B, T, E)  ->  (B, T, 1).

    Notes: cap t_tile_target at ~1024 on v5e (single vector-store slot);
    2048 is a good default on v6e/v7x.
    """
    B, _, E = query.shape
    T = user_behavior.shape[1]

    w1, b1, w2, b2, w3, b3 = params
    H1 = w1.shape[1]

    # ---- host-side exact algebraic folds (done once) ----------------------
    w1a, w1b, w1c, w1d = w1[:E], w1[E:2 * E], w1[2 * E:3 * E], w1[3 * E:4 * E]
    wq_eff = (w1a + w1c).T            # (H1, E)   -> folded into per-batch bias
    wub_eff = (w1b - w1c).T           # (H1, E)
    wp_eff = w1d.T                    # (H1, E)
    w23_t = (w2 @ w3).T               # (1, H1)   Linear(80,40) o Linear(40,1)
    b23_2d = (b2 @ w3 + b3).reshape(1, 1)

    # ---- tiling ------------------------------------------------------------
    assert t_tile_target % 128 == 0, "t_tile_target must be a multiple of 128"
    t_pad128 = pl.cdiv(T, 128) * 128          # small T -> pad up to 128 lanes
    t_tile = min(t_tile_target, t_pad128)
    t_pad = pl.cdiv(T, t_tile) * t_tile

    bt = max(1, min(b_tile_target, B))
    b_pad = pl.cdiv(B, bt) * bt

    # Pad batch (tiny); padded rows compute garbage that is sliced away.
    if b_pad > B:
        query = jnp.pad(query, ((0, b_pad - B), (0, 0), (0, 0)))

    # Per-batch first-layer bias column: (W1a+W1c)^T q_b + b1 -> (B_pad, H1, 1).
    # Hoisted to the host so no degenerate MXU op runs per grid step.
    biasq = jnp.einsum('he,bse->bhs', wq_eff, query) + b1[:, None]

    # Feature-major user behavior with T (and B) zero-padding.  Transpose+pad
    # fuse into one XLA copy under jit.
    # TODO(synk): supply user_behavior feature-major upstream to remove this
    # extra HBM pass entirely.
    ub_t = jnp.transpose(user_behavior, (0, 2, 1))                 # (B, E, T)
    ub_t = jnp.pad(ub_t, ((0, b_pad - B), (0, 0), (0, t_pad - T)))

    grid = (b_pad // bt, t_pad // t_tile)
    const = lambda b, t: (0, 0)               # resident weight / bias blocks

    out = pl.pallas_call(
        _lau_kernel,
        out_shape=jax.ShapeDtypeStruct((b_pad, 1, t_pad), jnp.float32),
        grid_spec=pltpu.PrefetchScalarGridSpec(
            num_scalar_prefetch=0,
            grid=grid,
            in_specs=[
                pl.BlockSpec((bt, 1, E), lambda b, t: (b, 0, 0)),        # query
                pl.BlockSpec((bt, E, t_tile), lambda b, t: (b, 0, t)),   # ub slab
                pl.BlockSpec((bt, H1, 1), lambda b, t: (b, 0, 0)),       # q-bias
                pl.BlockSpec((H1, E), const),                            # (W1b-W1c)^T
                pl.BlockSpec((H1, E), const),                            # W1d^T
                pl.BlockSpec((1, H1), const),                            # (W2@W3)^T
                pl.BlockSpec((1, 1), const),                             # b23
            ],
            out_specs=pl.BlockSpec((bt, 1, t_tile), lambda b, t: (b, 0, t)),
        ),
        compiler_params=pltpu.CompilerParams(
            dimension_semantics=("parallel", "parallel")),
    )(query, ub_t, biasq, wub_eff, wp_eff, w23_t, b23_2d)

    # (B_pad, 1, t_pad) -> (B, T, 1)
    return jnp.transpose(out[:B, :, :T], (0, 2, 1))


def init_params(key, embedding_dim=4, hidden_unit=(80, 40)):
    """Deterministic synthetic parameters (PyTorch Linear weights stored as (in, out))."""
    in_size = 4 * embedding_dim
    h1, h2 = hidden_unit
    k1, k2, k3, k4, k5, k6 = jax.random.split(key, 6)
    w1 = jax.random.normal(k1, (in_size, h1), jnp.float32) * 0.1
    b1 = jax.random.normal(k2, (h1,), jnp.float32) * 0.1
    w2 = jax.random.normal(k3, (h1, h2), jnp.float32) * 0.1
    b2 = jax.random.normal(k4, (h2,), jnp.float32) * 0.1
    w3 = jax.random.normal(k5, (h2, 1), jnp.float32) * 0.1
    b3 = jax.random.normal(k6, (1,), jnp.float32) * 0.1
    return (w1, b1, w2, b2, w3, b3)


def _reference(query, user_behavior, params):
    """Pure-JAX mirror of the PyTorch forward (no folding) for verification."""
    w1, b1, w2, b2, w3, b3 = params
    B, _, E = query.shape
    T = user_behavior.shape[1]
    q = jnp.broadcast_to(query, (B, T, E))
    x = jnp.concatenate([q, user_behavior, q - user_behavior, q * user_behavior], axis=-1)
    h1 = jnp.maximum(x @ w1 + b1, 0.0)
    h2 = h1 @ w2 + b2
    return h2 @ w3 + b3


if __name__ == "__main__":
    key = jax.random.PRNGKey(0)
    k_q, k_ub, k_p = jax.random.split(key, 3)

    lau = jax.jit(local_activation_unit,
                  static_argnames=("t_tile_target", "b_tile_target"))

    # Small shapes consistent with the module: batch=2, seq=8, embedding_dim=4.
    B, T, E = 2, 8, 4
    query = jax.random.normal(k_q, (B, 1, E), jnp.float32)
    user_behavior = jax.random.normal(k_ub, (B, T, E), jnp.float32)
    params = init_params(k_p, embedding_dim=E, hidden_unit=(80, 40))

    out = jax.block_until_ready(lau(query, user_behavior, params))
    ref = _reference(query, user_behavior, params)
    assert out.shape == (B, T, 1)
    assert jnp.allclose(out, ref, atol=1e-4, rtol=1e-4), "mismatch (small T)"

    # Exercise the multi-T-tile + T-padding path.
    T2 = 200
    k_q2, k_ub2 = jax.random.split(k_q)
    query2 = jax.random.normal(k_q2, (B, 1, E), jnp.float32)
    ub2 = jax.random.normal(k_ub2, (B, T2, E), jnp.float32)
    out2 = jax.block_until_ready(lau(query2, ub2, params, t_tile_target=128))
    ref2 = _reference(query2, ub2, params)
    assert out2.shape == (B, T2, 1)
    assert jnp.allclose(out2, ref2, atol=1e-4, rtol=1e-4), "mismatch (tiled T)"

    # Exercise batch blocking + batch padding (B not divisible by the block).
    B3, T3 = 3, 50
    k_q3, k_ub3 = jax.random.split(k_ub)
    query3 = jax.random.normal(k_q3, (B3, 1, E), jnp.float32)
    ub3 = jax.random.normal(k_ub3, (B3, T3, E), jnp.float32)
    out3 = jax.block_until_ready(lau(query3, ub3, params, b_tile_target=2))
    ref3 = _reference(query3, ub3, params)
    assert out3.shape == (B3, T3, 1)
    assert jnp.allclose(out3, ref3, atol=1e-4, rtol=1e-4), "mismatch (batch block)"

    print("KERNEL_OK")
</pallas_src>

<mosaic_0001>
module attributes {stable_mosaic.version = 11 : i64} {
  func.func @_lau_kernel(%arg0: i32, %arg1: i32, %arg2: memref<2x1x4xf32, #tpu.memory_space<vmem>>, %arg3: memref<2x4x128xf32, #tpu.memory_space<vmem>>, %arg4: memref<2x80x1xf32, #tpu.memory_space<vmem>>, %arg5: memref<80x4xf32, #tpu.memory_space<vmem>>, %arg6: memref<80x4xf32, #tpu.memory_space<vmem>>, %arg7: memref<1x80xf32, #tpu.memory_space<vmem>>, %arg8: memref<1x1xf32, #tpu.memory_space<vmem>>, %arg9: memref<2x1x128xf32, #tpu.memory_space<vmem>>) attributes {dimension_semantics = [#tpu.dimension_semantics<parallel>, #tpu.dimension_semantics<parallel>], iteration_bounds = array<i64: 1, 1>, scalar_prefetch = 0 : i64, scratch_operands = 0 : i64, tpu.core_type = #tpu.core_type<tc>, window_params = [{transform_indices = @transform_0, window_bounds = array<i64: 2, 1, 4>}, {transform_indices = @transform_1, window_bounds = array<i64: 2, 4, 128>}, {transform_indices = @transform_2, window_bounds = array<i64: 2, 80, 1>}, {pipeline_mode = #tpu.pipeline_mode<synchronous>, transform_indices = @transform_3, window_bounds = array<i64: 80, 4>}, {pipeline_mode = #tpu.pipeline_mode<synchronous>, transform_indices = @transform_4, window_bounds = array<i64: 80, 4>}, {pipeline_mode = #tpu.pipeline_mode<synchronous>, transform_indices = @transform_5, window_bounds = array<i64: 1, 80>}, {pipeline_mode = #tpu.pipeline_mode<synchronous>, transform_indices = @transform_6, window_bounds = array<i64: 1, 1>}, {transform_indices = @transform_7, window_bounds = array<i64: 2, 1, 128>}]} {
    %c0 = arith.constant 0 : index
    %c0_0 = arith.constant 0 : index
    %0 = vector.load %arg5[%c0, %c0_0] : memref<80x4xf32, #tpu.memory_space<vmem>>, vector<80x4xf32>
    %c0_1 = arith.constant 0 : index
    %c0_2 = arith.constant 0 : index
    %1 = vector.load %arg6[%c0_1, %c0_2] : memref<80x4xf32, #tpu.memory_space<vmem>>, vector<80x4xf32>
    %c0_3 = arith.constant 0 : index
    %c0_4 = arith.constant 0 : index
    %2 = vector.load %arg7[%c0_3, %c0_4] : memref<1x80xf32, #tpu.memory_space<vmem>>, vector<1x80xf32>
    %c0_5 = arith.constant 0 : index
    %c0_6 = arith.constant 0 : index
    %3 = vector.load %arg8[%c0_5, %c0_6] : memref<1x1xf32, #tpu.memory_space<vmem>>, vector<1x1xf32>
    %c0_i32 = arith.constant 0 : i32
    %4 = arith.index_cast %c0_i32 : i32 to index
    %c0_7 = arith.constant 0 : index
    %c0_8 = arith.constant 0 : index
    %5 = vector.load %arg2[%4, %c0_7, %c0_8] : memref<2x1x4xf32, #tpu.memory_space<vmem>>, vector<1x1x4xf32>
    %6 = vector.shape_cast %5 : vector<1x1x4xf32> to vector<1x4xf32>
    %7 = vector.broadcast %6 : vector<1x4xf32> to vector<80x4xf32>
    %8 = arith.mulf %1, %7 : vector<80x4xf32>
    %9 = arith.addf %0, %8 : vector<80x4xf32>
    %10 = arith.index_cast %c0_i32 : i32 to index
    %c0_9 = arith.constant 0 : index
    %c0_10 = arith.constant 0 : index
    %11 = vector.load %arg3[%10, %c0_9, %c0_10] : memref<2x4x128xf32, #tpu.memory_space<vmem>>, vector<1x4x128xf32>
    %12 = vector.shape_cast %11 : vector<1x4x128xf32> to vector<4x128xf32>
    %cst = arith.constant dense<0.000000e+00> : vector<80x128xf32>
    %13 = tpu.matmul %9, %12, %cst {dimension_numbers = #tpu.dot_dimension_numbers<[1], [0], [0], [1], [0, 0, 1, 1], [], []>} : vector<80x4xf32>, vector<4x128xf32>, vector<80x128xf32> -> vector<80x128xf32>
    %14 = arith.index_cast %c0_i32 : i32 to index
    %c0_11 = arith.constant 0 : index
    %c0_12 = arith.constant 0 : index
    %15 = vector.load %arg4[%14, %c0_11, %c0_12] : memref<2x80x1xf32, #tpu.memory_space<vmem>>, vector<1x80x1xf32>
    %16 = vector.shape_cast %15 : vector<1x80x1xf32> to vector<80x1xf32>
    %17 = vector.broadcast %16 : vector<80x1xf32> to vector<80x128xf32>
    %18 = arith.addf %13, %17 : vector<80x128xf32>
    %cst_13 = arith.constant 0.000000e+00 : f32
    %19 = vector.broadcast %cst_13 : f32 to vector<80x128xf32>
    %20 = arith.maximumf %18, %19 : vector<80x128xf32>
    %cst_14 = arith.constant dense<0.000000e+00> : vector<1x128xf32>
    %21 = tpu.matmul %2, %20, %cst_14 {dimension_numbers = #tpu.dot_dimension_numbers<[1], [0], [0], [1], [0, 0, 1, 1], [], []>} : vector<1x80xf32>, vector<80x128xf32>, vector<1x128xf32> -> vector<1x128xf32>
    %22 = vector.broadcast %3 : vector<1x1xf32> to vector<1x128xf32>
    %23 = arith.addf %21, %22 : vector<1x128xf32>
    %24 = arith.index_cast %c0_i32 : i32 to index
    %c0_15 = arith.constant 0 : index
    %c0_16 = arith.constant 0 : index
    %25 = vector.load %arg9[%24, %c0_15, %c0_16] : memref<2x1x128xf32, #tpu.memory_space<vmem>>, vector<1x1x128xf32>
    %26 = vector.shape_cast %25 : vector<1x1x128xf32> to vector<1x128xf32>
    %27 = vector.shape_cast %23 : vector<1x128xf32> to vector<1x1x128xf32>
    tpu.vector_store %arg9[%24, %c0_15, %c0_16], %27 {strides = array<i32>} : memref<2x1x128xf32, #tpu.memory_space<vmem>>, vector<1x1x128xf32>,
    %c1_i32 = arith.constant 1 : i32
    %28 = arith.index_cast %c1_i32 : i32 to index
    %c0_17 = arith.constant 0 : index
    %c0_18 = arith.constant 0 : index
    %29 = vector.load %arg2[%28, %c0_17, %c0_18] : memref<2x1x4xf32, #tpu.memory_space<vmem>>, vector<1x1x4xf32>
    %30 = vector.shape_cast %29 : vector<1x1x4xf32> to vector<1x4xf32>
    %31 = vector.broadcast %30 : vector<1x4xf32> to vector<80x4xf32>
    %32 = arith.mulf %1, %31 : vector<80x4xf32>
    %33 = arith.addf %0, %32 : vector<80x4xf32>
    %34 = arith.index_cast %c1_i32 : i32 to index
    %c0_19 = arith.constant 0 : index
    %c0_20 = arith.constant 0 : index
    %35 = vector.load %arg3[%34, %c0_19, %c0_20] : memref<2x4x128xf32, #tpu.memory_space<vmem>>, vector<1x4x128xf32>
    %36 = vector.shape_cast %35 : vector<1x4x128xf32> to vector<4x128xf32>
    %cst_21 = arith.constant dense<0.000000e+00> : vector<80x128xf32>
    %37 = tpu.matmul %33, %36, %cst_21 {dimension_numbers = #tpu.dot_dimension_numbers<[1], [0], [0], [1], [0, 0, 1, 1], [], []>} : vector<80x4xf32>, vector<4x128xf32>, vector<80x128xf32> -> vector<80x128xf32>
    %38 = arith.index_cast %c1_i32 : i32 to index
    %c0_22 = arith.constant 0 : index
    %c0_23 = arith.constant 0 : index
    %39 = vector.load %arg4[%38, %c0_22, %c0_23] : memref<2x80x1xf32, #tpu.memory_space<vmem>>, vector<1x80x1xf32>
    %40 = vector.shape_cast %39 : vector<1x80x1xf32> to vector<80x1xf32>
    %41 = vector.broadcast %40 : vector<80x1xf32> to vector<80x128xf32>
    %42 = arith.addf %37, %41 : vector<80x128xf32>
    %cst_24 = arith.constant 0.000000e+00 : f32
    %43 = vector.broadcast %cst_24 : f32 to vector<80x128xf32>
    %44 = arith.maximumf %42, %43 : vector<80x128xf32>
    %cst_25 = arith.constant dense<0.000000e+00> : vector<1x128xf32>
    %45 = tpu.matmul %2, %44, %cst_25 {dimension_numbers = #tpu.dot_dimension_numbers<[1], [0], [0], [1], [0, 0, 1, 1], [], []>} : vector<1x80xf32>, vector<80x128xf32>, vector<1x128xf32> -> vector<1x128xf32>
    %46 = vector.broadcast %3 : vector<1x1xf32> to vector<1x128xf32>
    %47 = arith.addf %45, %46 : vector<1x128xf32>
    %48 = arith.index_cast %c1_i32 : i32 to index
    %c0_26 = arith.constant 0 : index
    %c0_27 = arith.constant 0 : index
    %49 = vector.load %arg9[%48, %c0_26, %c0_27] : memref<2x1x128xf32, #tpu.memory_space<vmem>>, vector<1x1x128xf32>
    %50 = vector.shape_cast %49 : vector<1x1x128xf32> to vector<1x128xf32>
    %51 = vector.shape_cast %47 : vector<1x128xf32> to vector<1x1x128xf32>
    tpu.vector_store %arg9[%48, %c0_26, %c0_27], %51 {strides = array<i32>} : memref<2x1x128xf32, #tpu.memory_space<vmem>>, vector<1x1x128xf32>,
    %c2_i32 = arith.constant 2 : i32
    return
  }
  func.func @transform_0(%arg0: i32, %arg1: i32) -> (i32, i32, i32) {
    %c0_i32 = arith.constant 0 : i32
    %c0_i32_0 = arith.constant 0 : i32
    %c0_i32_1 = arith.constant 0 : i32
    return %arg0, %c0_i32, %c0_i32_0 : i32, i32, i32
  }
  func.func @transform_1(%arg0: i32, %arg1: i32) -> (i32, i32, i32) {
    %c0_i32 = arith.constant 0 : i32
    %c0_i32_0 = arith.constant 0 : i32
    return %arg0, %c0_i32, %arg1 : i32, i32, i32
  }
  func.func @transform_2(%arg0: i32, %arg1: i32) -> (i32, i32, i32) {
    %c0_i32 = arith.constant 0 : i32
    %c0_i32_0 = arith.constant 0 : i32
    %c0_i32_1 = arith.constant 0 : i32
    return %arg0, %c0_i32, %c0_i32_0 : i32, i32, i32
  }
  func.func @transform_3(%arg0: i32, %arg1: i32) -> (i32, i32) {
    %c0_i32 = arith.constant 0 : i32
    %c0_i32_0 = arith.constant 0 : i32
    %c0_i32_1 = arith.constant 0 : i32
    return %c0_i32, %c0_i32_0 : i32, i32
  }
  func.func @transform_4(%arg0: i32, %arg1: i32) -> (i32, i32) {
    %c0_i32 = arith.constant 0 : i32
    %c0_i32_0 = arith.constant 0 : i32
    %c0_i32_1 = arith.constant 0 : i32
    return %c0_i32, %c0_i32_0 : i32, i32
  }
  func.func @transform_5(%arg0: i32, %arg1: i32) -> (i32, i32) {
    %c0_i32 = arith.constant 0 : i32
    %c0_i32_0 = arith.constant 0 : i32
    %c0_i32_1 = arith.constant 0 : i32
    return %c0_i32, %c0_i32_0 : i32, i32
  }
  func.func @transform_6(%arg0: i32, %arg1: i32) -> (i32, i32) {
    %c0_i32 = arith.constant 0 : i32
    %c0_i32_0 = arith.constant 0 : i32
    %c0_i32_1 = arith.constant 0 : i32
    return %c0_i32, %c0_i32_0 : i32, i32
  }
  func.func @transform_7(%arg0: i32, %arg1: i32) -> (i32, i32, i32) {
    %c0_i32 = arith.constant 0 : i32
    %c0_i32_0 = arith.constant 0 : i32
    return %arg0, %c0_i32, %arg1 : i32, i32, i32
  }
}

</mosaic_0001>

<bundles_post_ra>
// kernel: local_activation_unit.1
= control target key start
LH: loop header
LB: loop body
LE: loop exit
PB: predicated region body
PF: predicated region fallthrough
CT: control target
= control target key end

     0   :  { %vm166_vm0 = vcmask 1043456   ;;  %v507_v0 = vmov 0   ;;  %vm135_vm1 = vcmask 31744   ;;  %vm233_vm2 = vcmask 654336   ;;  %s752_s2 = inlined_call_operand.vmem [shape: f32[2,80,1], index: 2, kind: input, shape index: {}]   ;;  %s753_s1 = inlined_call_operand.vmem [shape: f32[2,4,128], index: 1, kind: input, shape index: {}]   ;;  %s754_s0 = inlined_call_operand.vmem [shape: f32[2,1,4], index: 0, kind: input, shape index: {}]   ;;  %s755_s3 = inlined_call_operand.vmem [shape: f32[80,4], index: 3, kind: input, shape index: {}]   ;;  %s756_s4 = inlined_call_operand.vmem [shape: f32[80,4], index: 4, kind: input, shape index: {}]   ;;  %s757_s6 = inlined_call_operand.<no memory space> [shape: f32[1,1], index: 6, kind: input, shape index: {}]   ;;  %s758_s5 = inlined_call_operand.vmem [shape: f32[1,80], index: 5, kind: input, shape index: {}]   ;;  %s759_s7 = inlined_call_operand.vmem [shape: f32[2,1,128], index: 7, kind: output, shape index: {}]  }
   0x1   :  { %503 = vset.pattern.permute.xlu1 %v507_v0  ;;  %502 = vset.pattern.permute.xlu0 %v507_v0  ;;  %v485_v1 = vld [vmem:[%s752_s2 + $0x98] sm:$0xff]  ;;  %v483_v2 = vld [vmem:[%s752_s2 + $0x88] sm:$0xff]  ;;  %v74_v3 = vld [vmem:[%s753_s1] sm:$0xf]  ;;  %v12_v45 = vstv %s757_s6 }
   0x2   :  { %343 = vperm.xlu0 %502, %v485_v1   ;;  %333 = vperm.xlu1 %503, %v483_v2   ;;  %v475_v4 = vld [vmem:[%s753_s1 + $0x4] sm:$0xf]  ;;  %v571_v7 = vld [vmem:[%s754_s0] ss:$0 sm:$0xff]  ;;  %v34_v8 = vld [vmem:[%s755_s3 + $0x30] sm:$0xff] }
   0x3   :  { %v28_v5 = vld [vmem:[%s755_s3] sm:$0xff]  ;;  %462 = vmatpush.msk.msra.mxu0 %vm166_vm0, %v74_v3  ;;  %499 = vmatpush.msk.msra.mxu1 %vm166_vm0, %v74_v3  ;;  %v44_v9 = vld [vmem:[%s756_s4 + $0x30] sm:$0xff]  ;;  %v39_v15 = vld [vmem:[%s756_s4 + $0x8] sm:$0xff]  ;;  %13 = vst [vmem:[#allocation2] sm:$0x1] %v12_v45 }
   0x4   :  { %v38_v6 = vld [vmem:[%s756_s4] sm:$0xff]  ;;  %486 = vmatpush.msk.msra.mxu2 %vm166_vm0, %v475_v4  ;;  %500 = vmatpush.msk.msra.mxu3 %vm166_vm0, %v475_v4  ;;  %v60_v12 = vmul.f32 %v571_v7, %v44_v9  ;;  %v45_v16 = vld [vmem:[%s756_s4 + $0x38] sm:$0xff]  ;;  %v484_v22 = vld [vmem:[%s752_s2 + $0x90] sm:$0xff]  ;;  %v55_v24 = vmul.f32 %v571_v7, %v39_v15 }
   0x5   :  { %v584_v10 = vld [vmem:[%s754_s0 + $0x1] ss:$0 sm:$0xff]  ;;  %v54_v11 = vmul.f32 %v571_v7, %v38_v6  ;;  %504 = vset.pattern.permute.xlu2 %v507_v0  ;;  %v84_v23 = vld [vmem:[%s752_s2 + $0x48] sm:$0xff]  ;;  %v61_v25 = vmul.f32 %v571_v7, %v45_v16  ;;  %v35_v27 = vld [vmem:[%s755_s3 + $0x38] sm:$0xff] }
   0x6   :  { %v263_v13 = vmul.f32 %v584_v10, %v38_v6  ;;  %v269_v14 = vmul.f32 %v584_v10, %v44_v9  ;;  %v70_v18 = vadd.f32 %v60_v12, %v34_v8  ;;  %v482_v19 = vld [vmem:[%s752_s2 + $0x80] sm:$0xff]  ;;  %v29_v26 = vld [vmem:[%s755_s3 + $0x8] sm:$0xff]  ;;  %v264_v28 = vmul.f32 %v584_v10, %v39_v15  ;;  %v40_v35 = vld [vmem:[%s756_s4 + $0x10] sm:$0xff] }
   0x7   :  { %v64_v17 = vadd.f32 %v54_v11, %v28_v5  ;;  %328 = vperm.xlu2 %504, %v482_v19   ;;  %v270_v29 = vmul.f32 %v584_v10, %v45_v16  ;;  %v65_v30 = vadd.f32 %v55_v24, %v29_v26  ;;  %v71_v31 = vadd.f32 %v61_v25, %v35_v27  ;;  %v83_v32 = vld [vmem:[%s752_s2 + $0x40] sm:$0xff]  ;;  %v481_v37 = vld [vmem:[%s752_s2 + $0x78] sm:$0xff]  ;;  %v30_v41 = vld [vmem:[%s755_s3 + $0x10] sm:$0xff] }
   0x8   :  { %v273_v20 = vadd.f32 %v263_v13, %v28_v5  ;;  %v279_v21 = vadd.f32 %v269_v14, %v34_v8  ;;  %469 = vmatmul.msk.f32.vlgmr.msra.gmra.mxu1 %vm135_vm1, %v70_v18  ;;  %v274_v33 = vadd.f32 %v264_v28, %v29_v26  ;;  %v46_v36 = vld [vmem:[%s756_s4 + $0x40] sm:$0xff]  ;;  %v82_v38 = vld [vmem:[%s752_s2 + $0x38] sm:$0xff]  ;;  %v56_v39 = vmul.f32 %v571_v7, %v40_v35  ;;  %v480_v48 = vld [vmem:[%s752_s2 + $0x70] sm:$0xff] }
   0x9   :  { %463 = vmatmul.msk.f32.vlgmr.msra.gmra.mxu0 %vm135_vm1, %v64_v17  ;;  %v280_v34 = vadd.f32 %v270_v29, %v35_v27  ;;  %v62_v40 = vmul.f32 %v571_v7, %v46_v36  ;;  %v36_v42 = vld [vmem:[%s755_s3 + $0x40] sm:$0xff]  ;;  %v265_v43 = vmul.f32 %v584_v10, %v40_v35  ;;  %v271_v44 = vmul.f32 %v584_v10, %v46_v36  ;;  %v41_v51 = vld [vmem:[%s756_s4 + $0x18] sm:$0xff]  ;;  %v47_v52 = vld [vmem:[%s756_s4 + $0x48] sm:$0xff] }
   0xa   :  { %487 = vmatmul.msk.f32.vlgmr.msra.gmra.mxu2 %vm135_vm1, %v273_v20  ;;  %493 = vmatmul.msk.f32.vlgmr.msra.gmra.mxu3 %vm135_vm1, %v279_v21  ;;  %v66_v46 = vadd.f32 %v56_v39, %v30_v41  ;;  %v479_v53 = vld [vmem:[%s752_s2 + $0x68] sm:$0xff]  ;;  %v81_v54 = vld [vmem:[%s752_s2 + $0x30] sm:$0xff]  ;;  %v57_v55 = vmul.f32 %v571_v7, %v41_v51  ;;  %v63_v56 = vmul.f32 %v571_v7, %v47_v52  ;;  %v31_v57 = vld [vmem:[%s755_s3 + $0x18] sm:$0xff] }
   0xb   :  { %338 = vperm.xlu0 %502, %v484_v22   ;;  %132 = vperm.xlu1 %503, %v84_v23   ;;  %v72_v47 = vadd.f32 %v62_v40, %v36_v42  ;;  %v275_v49 = vadd.f32 %v265_v43, %v30_v41  ;;  %v281_v50 = vadd.f32 %v271_v44, %v36_v42  ;;  %v37_v58 = vld [vmem:[%s755_s3 + $0x48] sm:$0xff]  ;;  %v42_v2 = vld [vmem:[%s756_s4 + $0x20] sm:$0xff]  ;;  %v477_v11 = vld [vmem:[%s752_s2 + $0x58] sm:$0xff] }
   0xc   :  { %v266_v59 = vmul.f32 %v584_v10, %v41_v51  ;;  %v272_v60 = vmul.f32 %v584_v10, %v47_v52  ;;  %v67_v61 = vadd.f32 %v57_v55, %v31_v57  ;;  %v73_v62 = vadd.f32 %v63_v56, %v37_v58  ;;  %v80_v63 = vld [vmem:[%s752_s2 + $0x28] sm:$0xff]  ;;  %v478_v3 = vld [vmem:[%s752_s2 + $0x60] sm:$0xff]  ;;  %v476_v14 = vld [vmem:[%s752_s2 + $0x50] sm:$0xff] }
   0xd   :  { %v79_v4 = vld [vmem:[%s752_s2 + $0x20] sm:$0xff]  ;;  %v58_v5 = vmul.f32 %v571_v7, %v42_v2  ;;  %v267_v8 = vmul.f32 %v584_v10, %v42_v2  ;;  %v43_v13 = vld [vmem:[%s756_s4 + $0x28] sm:$0xff]  ;;  %v78_v15 = vld [vmem:[%s752_s2 + $0x18] sm:$0xff] }
   0xe   :  { %v276_v0 = vadd.f32 %v266_v59, %v31_v57  ;;  %v282_v1 = vadd.f32 %v272_v60, %v37_v58  ;;  %v32_v6 = vld [vmem:[%s755_s3 + $0x20] sm:$0xff]  ;;  %v59_v16 = vmul.f32 %v571_v7, %v43_v13  ;;  %v33_v17 = vld [vmem:[%s755_s3 + $0x28] sm:$0xff]  ;;  %v268_v18 = vmul.f32 %v584_v10, %v43_v13  ;;  %v77_v20 = vld [vmem:[%s752_s2 + $0x10] sm:$0xff] }
   0xf   :  { %127 = vperm.xlu2 %504, %v83_v32   ;;  %v68_v9 = vadd.f32 %v58_v5, %v32_v6  ;;  %v277_v12 = vadd.f32 %v267_v8, %v32_v6  ;;  %v76_v7 = vld [vmem:[%s752_s2 + $0x8] sm:$0xff]  ;;  %v75_v22 = vld [vmem:[%s752_s2] sm:$0xff] }
  0x10   :  { %470 = vmatmul.msk.f32.gmra.mxu1 %vm135_vm1, %v71_v31  ;;  %v69_v19 = vadd.f32 %v59_v16, %v33_v17  ;;  %v278_v21 = vadd.f32 %v268_v18, %v33_v17  ;;  %v49_v10 = vld [vmem:[#allocation2] sm:$0x1] }
  0x11   :  { %464 = vmatmul.msk.f32.gmra.mxu0 %vm135_vm1, %v65_v30 }
  0x12   :  { %488 = vmatmul.msk.f32.gmra.mxu2 %vm135_vm1, %v274_v33  ;;  %494 = vmatmul.msk.f32.gmra.mxu3 %vm135_vm1, %v280_v34 }
  0x13   :  { %323 = vperm.xlu0 %502, %v481_v37   ;;  %122 = vperm.xlu1 %503, %v82_v38  }
  0x17   :  { %318 = vperm.xlu2 %504, %v480_v48  }
  0x18   :  { %471 = vmatmul.msk.f32.gmra.mxu1 %vm135_vm1, %v72_v47 }
  0x19   :  { %465 = vmatmul.msk.f32.gmra.mxu0 %vm135_vm1, %v66_v46 }
  0x1a   :  { %489 = vmatmul.msk.f32.gmra.mxu2 %vm135_vm1, %v275_v49  ;;  %495 = vmatmul.msk.f32.gmra.mxu3 %vm135_vm1, %v281_v50 }
  0x1b   :  { %313 = vperm.xlu1 %503, %v479_v53   ;;  %117 = vperm.xlu0 %502, %v81_v54  }
  0x1f   :  { %112 = vperm.xlu2 %504, %v80_v63  }
  0x20   :  { %472 = vmatmul.msk.f32.gmra.mxu1 %vm135_vm1, %v73_v62 }
  0x21   :  { %466 = vmatmul.msk.f32.gmra.mxu0 %vm135_vm1, %v67_v61 }
  0x22   :  { %490 = vmatmul.msk.f32.gmra.mxu2 %vm135_vm1, %v276_v0  ;;  %496 = vmatmul.msk.f32.gmra.mxu3 %vm135_vm1, %v282_v1 }
  0x23   :  { %308 = vperm.xlu0 %502, %v478_v3   ;;  %107 = vperm.xlu1 %503, %v79_v4  }
  0x27   :  { %303 = vperm.xlu2 %504, %v477_v11  }
  0x29   :  { %467 = vmatmul.msk.f32.gmra.mxu0 %vm135_vm1, %v68_v9 }
  0x2a   :  { %491 = vmatmul.msk.f32.gmra.mxu2 %vm135_vm1, %v277_v12 }
  0x2b   :  { %298 = vperm.xlu1 %503, %v476_v14   ;;  %102 = vperm.xlu0 %502, %v78_v15  }
  0x2f   :  { %97 = vperm.xlu2 %504, %v77_v20  }
  0x31   :  { %468 = vmatmul.msk.f32.gmra.mxu0 %vm135_vm1, %v69_v19 }
  0x32   :  { %492 = vmatmul.msk.f32.gmra.mxu2 %vm135_vm1, %v278_v21 }
  0x33   :  { %92 = vperm.xlu0 %502, %v76_v7   ;;  %87 = vperm.xlu1 %503, %v75_v22  }
  0x37   :  { %229 = vperm.xlu2 %504, %v49_v10  }
  0x61   :  { %v329_v25 = vpop.permute.xlu2 %328 }
  0x69   :  { %v128_v30 = vpop.permute.xlu2 %127 }
  0x71   :  { %v319_v37 = vpop.permute.xlu2 %318 }
  0x74   :  { %v344_v23 = vpop.permute.xlu0 %343  ;;  %v334_v24 = vpop.permute.xlu1 %333 }
  0x79   :  { %v113_v46 = vpop.permute.xlu2 %112 }
  0x7d   :  { %v339_v26 = vpop.permute.xlu0 %338  ;;  %v133_v27 = vpop.permute.xlu1 %132 }
  0x81   :  { %v304_v2 = vpop.permute.xlu2 %303 }
  0x85   :  { %v205_v29 = vpop.f32.mrf.mxu1  ;;  %v733_v31 = vpop.permute.xlu0 %323 }
  0x86   :  { %v731_v28 = vpop.f32.mrf.mxu0  ;;  %v123_v32 = vpop.permute.xlu1 %122 }
  0x89   :  { %v98_v17 = vpop.permute.xlu2 %97 }
  0x8d   :  { %v735_v33 = vpop.f32.mrf.mxu2  ;;  %v414_v34 = vpop.f32.mrf.mxu3 }
  0x8e   :  { %v190_v35 = vpop.f32.mrf.mxu0  ;;  %v208_v36 = vpop.f32.mrf.mxu1  ;;  %v415_v4 = vadd.f32 %v414_v34, %v329_v25 }
  0x8f   :  { %v118_v38 = vpop.permute.xlu0 %117  ;;  %v314_v41 = vpop.permute.xlu1 %313  ;;  %v209_v53 = vadd.f32 %v208_v36, %v123_v32 }
  0x90   :  { %v206_v55 = vadd.f32 %v205_v29, %v118_v38  ;;  %v432_v11 = vmax.f32 %v415_v4, 0.0 }
  0x91   :  { %v224_v59 = vmax.f32 %v209_v53, 0.0 }
  0x92   :  { %v223_v63 = vmax.f32 %v206_v55, 0.0 }
  0x95   :  { %v737_v39 = vpop.f32.mrf.mxu2  ;;  %v417_v40 = vpop.f32.mrf.mxu3 }
  0x96   :  { %v193_v42 = vpop.f32.mrf.mxu0  ;;  %v211_v43 = vpop.f32.mrf.mxu1  ;;  %v418_v0 = vadd.f32 %v417_v40, %v334_v24  ;;  %v400_v36 = vadd.f32 %v737_v39, %v304_v2 }
  0x97   :  { %v309_v47 = vpop.permute.xlu0 %308  ;;  %v212_v50 = vadd.f32 %v211_v43, %v128_v30  ;;  %v108_v52 = vpop.permute.xlu1 %107  ;;  %v194_v19 = vadd.f32 %v193_v42, %v98_v17 }
  0x98   :  { %v433_v8 = vmax.f32 %v418_v0, 0.0  ;;  %v230_v39 = vpop.permute.xlu2 %229 }
  0x99   :  { %v225_v56 = vmax.f32 %v212_v50, 0.0  ;;  %v219_v25 = vmax.f32 %v194_v19, 0.0  ;;  %v232_v42 = vperm.slane %v230_v39, 0 }
  0x9d   :  { %v402_v44 = vpop.f32.mrf.mxu2  ;;  %v420_v45 = vpop.f32.mrf.mxu3 }
  0x9e   :  { %v196_v48 = vpop.f32.mrf.mxu0  ;;  %v214_v49 = vpop.f32.mrf.mxu1  ;;  %v421_v60 = vadd.f32 %v420_v45, %v339_v26  ;;  %v403_v30 = vadd.f32 %v402_v44, %v309_v47 }
  0x9f   :  { %v215_v51 = vadd.f32 %v214_v49, %v133_v27  ;;  %v103_v3 = vpop.permute.xlu0 %102  ;;  %v299_v6 = vpop.permute.xlu1 %298 }
  0xa0   :  { %v434_v5 = vmax.f32 %v421_v60, 0.0  ;;  %v197_v15 = vadd.f32 %v196_v48, %v103_v3 }
  0xa1   :  { %v226_v54 = vmax.f32 %v215_v51, 0.0 }
  0xa2   :  { %v220_v22 = vmax.f32 %v197_v15, 0.0 }
  0xa3   :  { %243 = vmatpush.msrb.mxu1 %v226_v54 }
  0xa5   :  { %v405_v57 = vpop.f32.mrf.mxu2  ;;  %v423_v58 = vpop.f32.mrf.mxu3  ;;  %244 = vmatpush.msrb.mxu1 %v225_v56 }
  0xa6   :  { %v424_v61 = vadd.f32 %v423_v58, %v344_v23  ;;  %v199_v62 = vpop.f32.mrf.mxu0  ;;  %v406_v26 = vadd.f32 %v405_v57, %v314_v41 }
  0xa7   :  { %245 = vmatpush.msrb.mxu1 %v224_v59  ;;  %v200_v13 = vadd.f32 %v199_v62, %v108_v52  ;;  %v93_v18 = vpop.permute.xlu0 %92  ;;  %v88_v21 = vpop.permute.xlu1 %87 }
  0xa8   :  { %v435_v1 = vmax.f32 %v424_v61, 0.0  ;;  %v191_v10 = vadd.f32 %v190_v35, %v93_v18  ;;  %v188_v27 = vadd.f32 %v731_v28, %v88_v21  ;;  %v429_v38 = vmax.f32 %v406_v26, 0.0 }
  0xa9   :  { %246 = vmatpush.msrb.mxu1 %v223_v63  ;;  %v221_v20 = vmax.f32 %v200_v13, 0.0  ;;  %v428_v35 = vmax.f32 %v403_v30, 0.0  ;;  %v397_v28 = vadd.f32 %v735_v33, %v299_v6 }
  0xaa   :  { %442 = vmatpush.msrb.mxu3 %v435_v1  ;;  %v218_v32 = vmax.f32 %v191_v10, 0.0  ;;  %v217_v40 = vmax.f32 %v188_v27, 0.0 }
  0xab   :  { %v426_v41 = vmax.f32 %v397_v28, 0.0 }
  0xac   :  { %443 = vmatpush.msrb.mxu3 %v434_v5 }
  0xad   :  { %v408_v9 = vpop.f32.mrf.mxu2 }
  0xae   :  { %444 = vmatpush.msrb.mxu3 %v433_v8  ;;  %v202_v12 = vpop.f32.mrf.mxu0  ;;  %v409_v23 = vadd.f32 %v408_v9, %v319_v37  ;;  %v427_v37 = vmax.f32 %v400_v36, 0.0 }
  0xaf   :  { %v203_v14 = vadd.f32 %v202_v12, %v113_v46 }
  0xb0   :  { %445 = vmatpush.msrb.mxu3 %v432_v11  ;;  %v430_v34 = vmax.f32 %v409_v23, 0.0 }
  0xb1   :  { %v222_v16 = vmax.f32 %v203_v14, 0.0 }
  0xb3   :  { %247 = vmatpush.msrb.mxu1 %v222_v16 }
  0xb5   :  { %v411_v7 = vpop.f32.mrf.mxu2  ;;  %248 = vmatpush.msrb.mxu1 %v221_v20 }
  0xb6   :  { %v412_v24 = vadd.f32 %v411_v7, %v733_v31  ;;  %v48_v31 = vld [vmem:[%s758_s5] sm:$0x1] }
  0xb7   :  { %249 = vmatpush.msrb.mxu1 %v220_v22 }
  0xb8   :  { %v431_v29 = vmax.f32 %v412_v24, 0.0 }
  0xb9   :  { %250 = vmatpush.msrb.mxu1 %v219_v25 }
  0xba   :  { %446 = vmatpush.msrb.mxu3 %v431_v29 }
  0xbb   :  { %251 = vmatpush.msrb.mxu1 %v218_v32 }
  0xbc   :  { %447 = vmatpush.msrb.mxu3 %v430_v34 }
  0xbd   :  { %252 = vmatpush.msrb.mxu1 %v217_v40 }
  0xbe   :  { %448 = vmatpush.msrb.mxu3 %v429_v38  ;;  %473 = vmatmul.msk.f32.vlgmr.msrb.gmra.mxu1 %vm233_vm2, %v48_v31 }
  0xc0   :  { %449 = vmatpush.msrb.mxu3 %v428_v35 }
  0xc2   :  { %450 = vmatpush.msrb.mxu3 %v427_v37 }
  0xc4   :  { %451 = vmatpush.msrb.mxu3 %v426_v41 }
  0xc5   :  { %497 = vmatmul.msk.f32.vlgmr.msrb.gmra.mxu3 %vm233_vm2, %v48_v31 }
 0x13b   :  { %v254_v43 = vpop.f32.mrf.mxu1 }
 0x13c   :  { %v255_v44 = vadd.f32 %v254_v43, %v232_v42 }
 0x13e   :  { %257 = vst [vmem:[%s759_s7] sm:$0x1] %v255_v44 }
 0x148   :  { %v453_v45 = vpop.f32.mrf.mxu3 }
 0x149   :  { %v454_v46 = vadd.f32 %v453_v45, %v232_v42 }
 0x14b   :  { %498 = vst [vmem:[%s759_s7 + $0x1] sm:$0x1] %v454_v46 }

</bundles_post_ra>
